<compile_context>
chip_gen: v7x
topology: tpu7x:2x2x1
jax: 0.10.0
libtpu: 0.0.40
codegen_flags: <defaults>
</compile_context>

<pallas_src>
import math

import numpy as np

import jax
import jax.numpy as jnp
from jax.experimental import pallas as pl
from jax.experimental.pallas import tpu as pltpu


def _round_up(x: int, m: int) -> int:
    return ((x + m - 1) // m) * m


def _choose_row_tile(b: int, out_dim: int) -> int:
    """Batch tile (multiple of 8).

    Budget counts BOTH the output tile (lane-padded width) and the (tb, 1)
    time block, whose last dim pads to 128 lanes in VMEM (128x its HBM size).
    Also caps the tile so that b_pad >= 16 gives at least 2 grid steps, so the
    "parallel" batch axis can be sharded across v7x's two TensorCores.
    """
    b_pad8 = _round_up(b, 8)
    padded_cols = _round_up(out_dim, 128)          # output tile lane width
    bytes_per_row = (padded_cols + 128) * 4        # out row + 128-lane time row, f32
    budget = 4 * 1024 * 1024                       # ~4 MiB/buffer -> ~8 MiB double-buffered
    budget_rows = max(8, ((budget // bytes_per_row) // 8) * 8)
    tb = min(b_pad8, budget_rows)
    if b_pad8 >= 16:
        # Guarantee >= 2 grid steps so the second TC (v7x) gets work.
        tb = min(tb, _round_up(-(-b_pad8 // 2), 8))
    return max(8, tb)


def _sinusoidal_kernel(freq_ref, phase_ref, t_ref, out_ref):
    # (tb, 1) * (1, D) -> (tb, D) on the VPU, single sin over the full width:
    #   columns [0, half)        : phase 0      -> sin(t * f)
    #   columns [half, 2*half)   : phase pi/2   -> cos(t * f)
    #   odd-dim pad column       : freq 0, phase 0 -> sin(0) = 0
    # One full-width, lane-dense store; no intermediate `args` plane is kept
    # alive for a second reader.
    out_ref[...] = jnp.sin(t_ref[...] * freq_ref[...] + phase_ref[...])


def sinusoidal_pos_emb(time: jax.Array, dim: int) -> jax.Array:
    """Pallas equivalent of PyTorch SinusoidalPosEmb(dim)(time)."""
    assert time.ndim == 1, "time must be shape (B,)"
    # dim == 2 (half == 1) would divide by zero in log(10000)/(half-1),
    # exactly like the reference PyTorch module; reject it explicitly.
    assert dim >= 4, "dim must be >= 4"

    b = time.shape[0]
    half = dim // 2
    out_dim = dim  # odd-dim zero column lives inside the same output

    # Constant-per-dim tables, built host-side with numpy (no per-call XLA op).
    scale = math.log(10000.0) / (half - 1)
    freqs_np = np.exp(np.arange(half, dtype=np.float64) * (-scale)).astype(np.float32)
    freq_full_np = np.zeros((1, out_dim), np.float32)
    freq_full_np[0, :half] = freqs_np
    freq_full_np[0, half:2 * half] = freqs_np       # trailing odd column stays 0
    phase_np = np.zeros((1, out_dim), np.float32)
    phase_np[0, half:2 * half] = np.float32(math.pi / 2.0)  # cos(x) = sin(x + pi/2)

    freq_full = jnp.asarray(freq_full_np)
    phase = jnp.asarray(phase_np)

    tb = _choose_row_tile(b, out_dim)
    b_pad = _round_up(b, tb)
    t2d = time.astype(jnp.float32).reshape(b, 1)
    if b_pad != b:
        t2d = jnp.pad(t2d, ((0, b_pad - b), (0, 0)))  # pad rows sliced off below

    grid = (b_pad // tb,)
    # Same block every grid step -> tables stay resident in VMEM.
    table_spec = pl.BlockSpec((1, out_dim), lambda i: (0, 0))
    t_spec = pl.BlockSpec((tb, 1), lambda i: (i, 0))
    out_spec = pl.BlockSpec((tb, out_dim), lambda i: (i, 0))

    out = pl.pallas_call(
        _sinusoidal_kernel,
        out_shape=jax.ShapeDtypeStruct((b_pad, out_dim), jnp.float32),
        grid=grid,
        in_specs=[table_spec, table_spec, t_spec],
        out_specs=out_spec,
        compiler_params=pltpu.CompilerParams(
            # Batch axis is independent -> v7x shards it across its 2 TCs
            # (the sin polynomial on the VALU is the binding unit, so this is
            # the ~2x lever there; no-op on v5e/v6e).
            dimension_semantics=("parallel",),
        ),
        cost_estimate=pl.CostEstimate(
            flops=2 * b_pad * out_dim,
            transcendentals=b_pad * out_dim,
            bytes_accessed=b_pad * out_dim * 4 + b_pad * 4 + 2 * out_dim * 4,
        ),
    )(freq_full, phase, t2d)

    return out[:b]


def _reference(time: jax.Array, dim: int) -> jax.Array:
    """Straight port of the PyTorch module in plain JAX (f32)."""
    half = dim // 2
    scale = math.log(10000.0) / (half - 1)
    freqs = jnp.exp(jnp.arange(half, dtype=jnp.float32) * (-scale))
    args = time.astype(jnp.float32)[:, None] * freqs[None, :]
    emb = jnp.concatenate([jnp.sin(args), jnp.cos(args)], axis=-1)
    if dim % 2 == 1:
        emb = jnp.concatenate(
            [emb, jnp.zeros((time.shape[0], 1), jnp.float32)], axis=-1
        )
    return emb


if __name__ == "__main__":
    key = jax.random.PRNGKey(0)
    batch = 8
    time = jax.random.uniform(key, (batch,), dtype=jnp.float32) * 100.0

    # dim=32 (non-128-aligned half), dim=256 (128-aligned half), dim=33 (odd:
    # in-kernel zero column) all go through the same unified phase-table path.
    for dim in (32, 256, 33):
        emb = sinusoidal_pos_emb(time, dim)
        jax.block_until_ready(emb)
        ref = _reference(time, dim)
        assert emb.shape == (batch, dim), (emb.shape, dim)
        assert jnp.allclose(emb, ref, atol=1e-4, rtol=1e-5), f"mismatch at dim={dim}"

    print("KERNEL_OK")
</pallas_src>

<mosaic_0001>
module attributes {stable_mosaic.version = 11 : i64} {
  func.func @_sinusoidal_kernel(%arg0: i32, %arg1: memref<1x32xf32, #tpu.memory_space<vmem>>, %arg2: memref<1x32xf32, #tpu.memory_space<vmem>>, %arg3: memref<8x1xf32, #tpu.memory_space<vmem>>, %arg4: memref<8x32xf32, #tpu.memory_space<vmem>>) attributes {dimension_semantics = [#tpu.dimension_semantics<parallel>], iteration_bounds = array<i64: 1>, scalar_prefetch = 0 : i64, scratch_operands = 0 : i64, tpu.core_type = #tpu.core_type<tc>, window_params = [{pipeline_mode = #tpu.pipeline_mode<synchronous>, transform_indices = @transform_0, window_bounds = array<i64: 1, 32>}, {pipeline_mode = #tpu.pipeline_mode<synchronous>, transform_indices = @transform_1, window_bounds = array<i64: 1, 32>}, {transform_indices = @transform_2, window_bounds = array<i64: 8, 1>}, {transform_indices = @transform_3, window_bounds = array<i64: 8, 32>}]} {
    %c0 = arith.constant 0 : index
    %c0_0 = arith.constant 0 : index
    %0 = vector.load %arg3[%c0, %c0_0] : memref<8x1xf32, #tpu.memory_space<vmem>>, vector<8x1xf32>
    %c0_1 = arith.constant 0 : index
    %c0_2 = arith.constant 0 : index
    %1 = vector.load %arg1[%c0_1, %c0_2] : memref<1x32xf32, #tpu.memory_space<vmem>>, vector<1x32xf32>
    %2 = vector.broadcast %0 : vector<8x1xf32> to vector<8x32xf32>
    %3 = vector.broadcast %1 : vector<1x32xf32> to vector<8x32xf32>
    %4 = arith.mulf %2, %3 : vector<8x32xf32>
    %c0_3 = arith.constant 0 : index
    %c0_4 = arith.constant 0 : index
    %5 = vector.load %arg2[%c0_3, %c0_4] : memref<1x32xf32, #tpu.memory_space<vmem>>, vector<1x32xf32>
    %6 = vector.broadcast %5 : vector<1x32xf32> to vector<8x32xf32>
    %7 = arith.addf %4, %6 : vector<8x32xf32>
    %8 = math.sin %7 : vector<8x32xf32>
    %c0_5 = arith.constant 0 : index
    %c0_6 = arith.constant 0 : index
    %9 = vector.load %arg4[%c0_5, %c0_6] : memref<8x32xf32, #tpu.memory_space<vmem>>, vector<8x32xf32>
    tpu.vector_store %arg4[%c0_5, %c0_6], %8 {strides = array<i32>} : memref<8x32xf32, #tpu.memory_space<vmem>>, vector<8x32xf32>,
    return
  }
  func.func @transform_0(%arg0: i32) -> (i32, i32) {
    %c0_i32 = arith.constant 0 : i32
    %c0_i32_0 = arith.constant 0 : i32
    %c0_i32_1 = arith.constant 0 : i32
    return %c0_i32, %c0_i32_0 : i32, i32
  }
  func.func @transform_1(%arg0: i32) -> (i32, i32) {
    %c0_i32 = arith.constant 0 : i32
    %c0_i32_0 = arith.constant 0 : i32
    %c0_i32_1 = arith.constant 0 : i32
    return %c0_i32, %c0_i32_0 : i32, i32
  }
  func.func @transform_2(%arg0: i32) -> (i32, i32) {
    %c0_i32 = arith.constant 0 : i32
    %c0_i32_0 = arith.constant 0 : i32
    return %arg0, %c0_i32 : i32, i32
  }
  func.func @transform_3(%arg0: i32) -> (i32, i32) {
    %c0_i32 = arith.constant 0 : i32
    %c0_i32_0 = arith.constant 0 : i32
    return %arg0, %c0_i32 : i32, i32
  }
}

</mosaic_0001>

<bundles_post_ra>
// kernel: tpu_custom_call.1
= control target key start
LH: loop header
LB: loop body
LE: loop exit
PB: predicated region body
PF: predicated region fallthrough
CT: control target
= control target key end

     0   :  { %v204_v1 = vmov 0   ;;  %s274_s0 = inlined_call_operand.vmem [shape: f32[1,32], index: 0, kind: input, shape index: {}]   ;;  %s275_s1 = inlined_call_operand.vmem [shape: f32[1,32], index: 1, kind: input, shape index: {}]   ;;  %s276_s2 = inlined_call_operand.vmem [shape: f32[8,1], index: 2, kind: input, shape index: {}]   ;;  %s277_s3 = inlined_call_operand.hbm [shape: f32[8,32], index: 3, kind: output, shape index: {}]  }
   0x1   :  { %v15_v0 = vld [vmem:[%s276_s2] sm:$0xff]  ;;  %175 = vset.pattern.permute.xlu0 %v204_v1 }
   0x2   :  { %19 = vperm.xlu0 %175, %v15_v0  }
   0x3   :  { %8 = vsyncpa [#allocation3], 0  ;;  %v157_v2 = vld [vmem:[%s274_s0] ss:$0 sm:$0xff]  ;;  %v205_v18 = vmov 2102212464  }
   0x4   :  { %v158_v3 = vld [vmem:[%s275_s1] ss:$0 sm:$0xff]  ;;  %v206_v20 = vmov 920167782   ;;  %v207_v24 = vmov 1326507024  }
   0x5   :  { %v208_v26 = vmov 683565275   ;;  %v209_v28 = vmov 2475754826   ;;  %v210_v31 = vmov 2131351028  }
   0x6   :  { %s211_s0 = smov [#allocation2]   ;;  %vm141_vm12 = vcmask 261120  }
   0x7   :  { %s149_s1 = sshll.u32 %s211_s0, 4  ;;  %s150_s1 = int_to_ptr.vmem [resolvable:$true] %s149_s1 }
   0x8   :  { %s180_s2 = scalar_lea.vmem %s150_s1, 128  ;;  %p185_p1 = scmp.lt.s32.totalorder %s150_s1, %s150_s1 }
   0x9   :  { %p181_p0 = scmp.ne.s32.totalorder %s150_s1, %s180_s2  ;;  %p186_p2 = scmp.lt.s32.totalorder %s180_s2, %s180_s2 }
   0xb   :  { %p187_p3 = por %p186_p2, %p185_p1 }
   0xd   :  { %p188_p4 = pnand %p187_p3, %p181_p0 }
  0x81   :  { %v20_v4 = vpop.permute.xlu0 %19 }
  0x82   :  { %v28_v5 = vmul.f32 %v157_v2, %v20_v4 }
  0x84   :  { %v241_v6 = vadd.f32 %v158_v3, %v28_v5 }
  0x86   :  { %v40_v7 = vand.u32 2139095040, %v241_v6  ;;  %v37_v8 = vand.u32 2147483647, %v241_v6  ;;  %vm39_vm7 = vcmp.lt.s32.totalorder %v241_v6, 0  ;;  %vm129_vm13 = vweird.f32 %v241_v6 }
  0x88   :  { %v41_v9 = vshrl.u32 %v40_v7, 23  ;;  %v44_v11 = vand.u32 8388607, %v37_v8  ;;  %vm38_vm8 = vcmp.le.f32.partialorder %v37_v8, 0.7853982 }
  0x8a   :  { %v159_v10 = vadd.s32 4294967169, %v41_v9  ;;  %v45_v14 = vor.u32 8388608, %v44_v11 }
  0x8c   :  { %v47_v12 = vadd.s32 1, %v159_v10  ;;  %v85_v22 = vshll.u32 %v45_v14, 8 }
  0x8e   :  { %vm48_vm0 = vcmp.gt.s32.totalorder %v47_v12, 0 }
  0x8f   :  { %v49_v13 = vsel %vm48_vm0, %v47_v12, 0 }
  0x90   :  { %v51_v15 = vand.u32 31, %v49_v13  ;;  %v50_v16 = vshrl.u32 %v49_v13, 5 }
  0x92   :  { %v52_v17 = vsub.s32 32, %v51_v15  ;;  %v63_v19 = vshll.u32 %v205_v18, %v51_v15  ;;  %v66_v21 = vshll.u32 %v206_v20, %v51_v15  ;;  %v54_v27 = vshll.u32 %v208_v26, %v51_v15 }
  0x93   :  { %v57_v30 = vshll.u32 %v209_v28, %v51_v15  ;;  %v60_v33 = vshll.u32 %v210_v31, %v51_v15  ;;  %vm72_vm1 = vcmp.lt.s32.totalorder %v50_v16, 4  ;;  %vm69_vm2 = vcmp.lt.s32.totalorder %v50_v16, 1 }
  0x94   :  { %v64_v23 = vshrl.u32 %v206_v20, %v52_v17  ;;  %v67_v25 = vshrl.u32 %v207_v24, %v52_v17  ;;  %v55_v29 = vshrl.u32 %v209_v28, %v52_v17  ;;  %v58_v32 = vshrl.u32 %v210_v31, %v52_v17 }
  0x95   :  { %v61_v34 = vshrl.u32 %v205_v18, %v52_v17  ;;  %v53_v38 = vshrl.u32 %v208_v26, %v52_v17  ;;  %vm70_vm3 = vcmp.lt.s32.totalorder %v50_v16, 2  ;;  %vm71_vm4 = vcmp.lt.s32.totalorder %v50_v16, 3 }
  0x96   :  { %v65_v35 = vor.u32 %v64_v23, %v63_v19  ;;  %v68_v36 = vor.u32 %v67_v25, %v66_v21  ;;  %v56_v37 = vor.u32 %v55_v29, %v54_v27  ;;  %v59_v39 = vor.u32 %v58_v32, %v57_v30 }
  0x97   :  { %v62_v40 = vor.u32 %v61_v34, %v60_v33 }
  0x98   :  { %v78_v41 = vsel %vm72_vm1, %v65_v35, 920167782  ;;  %v82_v42 = vsel %vm72_vm1, %v68_v36, 1326507024  ;;  %v77_v44 = vsel %vm69_vm2, %v56_v37, %v59_v39  ;;  %v73_v47 = vsel %vm69_vm2, %v53_v38, %v56_v37 }
  0x99   :  { %v74_v43 = vsel %vm72_vm1, %v62_v40, 2102212464  ;;  %v79_v45 = vsel %vm71_vm4, %v62_v40, %v78_v41  ;;  %v81_v46 = vsel %vm69_vm2, %v59_v39, %v62_v40  ;;  %v83_v50 = vsel %vm71_vm4, %v65_v35, %v82_v42 }
  0x9a   :  { %v75_v48 = vsel %vm71_vm4, %v59_v39, %v74_v43  ;;  %v80_v49 = vsel %vm70_vm3, %v77_v44, %v79_v45  ;;  %v84_v51 = vsel %vm70_vm3, %v81_v46, %v83_v50 }
  0x9b   :  { %v247_v52 = vmul.u32.u64.low %v85_v22, %v80_v49  ;;  %v248_v53 = vmul.u32.u64.high %v85_v22, %v80_v49, %v247_v52  ;;  %v250_v54 = vmul.u32.u64.low %v85_v22, %v84_v51  ;;  %v251_v55 = vmul.u32.u64.high %v85_v22, %v84_v51, %v250_v54 }
  0x9c   :  { %v76_v56 = vsel %vm70_vm3, %v73_v47, %v75_v48 }
  0x9d   :  { %v95_v57 = vadd.s32 1, %v248_v53  ;;  %v92_v58 = vmul.u32 %v85_v22, %v76_v56  ;;  %vm94_vm5 = vc.u32 %v251_v55, %v247_v52  ;;  %v93_v7 = vadd.s32 %v247_v52, %v251_v55 }
  0x9f   :  { %v96_v59 = vsel %vm94_vm5, %v95_v57, %v248_v53 }
  0xa0   :  { %v97_v60 = vadd.s32 %v96_v59, %v92_v58 }
  0xa2   :  { %v98_v61 = vadd.s32 536870912, %v97_v60 }
  0xa4   :  { %v99_v62 = vshrl.u32 %v98_v61, 30 }
  0xa6   :  { %v100_v63 = vshll.u32 %v99_v62, 30  ;;  %v123_v20 = vsub.s32 4, %v99_v62 }
  0xa8   :  { %v101_v0 = vsub.s32 %v97_v60, %v100_v63  ;;  %v124_v23 = vsel %vm39_vm7, %v123_v20, %v99_v62 }
  0xa9   :  { %v126_v25 = vsel %vm38_vm8, 0, %v124_v23 }
  0xaa   :  { %v103_v1 = vsub.s32 0, %v101_v0  ;;  %v130_v26 = vadd.s32 3, %v126_v25 }
  0xac   :  { %v160_v2 = vmin.u32 %v103_v1, %v101_v0  ;;  %v131_v27 = vand.u32 3, %v130_v26 }
  0xae   :  { %v105_v3 = vclz %v160_v2  ;;  %vm136_vm9 = vcmp.eq.s32.totalorder %v131_v27, 2  ;;  %vm133_vm10 = vcmp.eq.s32.totalorder %v131_v27, 0  ;;  %vm132_vm11 = vcmp.lt.s32.totalorder %v131_v27, 2 }
  0xb0   :  { %v161_v4 = vadd.s32 4294967294, %v105_v3 }
  0xb2   :  { %vm162_vm6 = vcmp.lt.s32.totalorder %v161_v4, 0 }
  0xb3   :  { %v108_v5 = vsel %vm162_vm6, 0, %v161_v4 }
  0xb4   :  { %v109_v9 = vsub.s32 32, %v108_v5  ;;  %v113_v10 = vsub.s32 4294967266, %v108_v5  ;;  %v110_v11 = vshll.u32 %v101_v0, %v108_v5 }
  0xb6   :  { %v111_v12 = vshrl.u32 %v93_v7, %v109_v9  ;;  %v114_v13 = vadd.s32 127, %v113_v10 }
  0xb8   :  { %v112_v14 = vor.u32 %v111_v12, %v110_v11  ;;  %v115_v15 = vshll.u32 %v114_v13, 23 }
  0xba   :  { %v116_v16 = vor.u32 4788187, %v115_v15  ;;  %v119_v18 = vcvt.s32.f32 %v112_v14 }
  0xbc   :  { %v117_v17 = vand.u32 2147483647, %v116_v16 }
  0xbe   :  { %v120_v19 = vmul.f32 %v119_v18, %v117_v17 }
  0xc0   :  { %v121_v21 = vxor.u32 2147483648, %v120_v19 }
  0xc2   :  { %v122_v22 = vsel %vm39_vm7, %v121_v21, %v120_v19 }
  0xc3   :  { %v125_v24 = vsel %vm38_vm8, %v241_v6, %v122_v22 }
  0xc4   :  { %176 = vcosq.f32 %v125_v24 }
  0xc5   :  { %178 = vsinq.f32 %v125_v24 }
  0xce   :  { %v177_v28 = vpop.eup %176 }
  0xcf   :  { %v179_v29 = vpop.eup %178  ;;  %v137_v30 = vxor.u32 2147483648, %v177_v28 }
  0xd0   :  { %v134_v31 = vxor.u32 2147483648, %v179_v29 }
  0xd1   :  { %v138_v32 = vsel %vm136_vm9, %v137_v30, %v179_v29 }
  0xd2   :  { %v135_v8 = vsel %vm133_vm10, %v177_v28, %v134_v31 }
  0xd3   :  { %v139_v33 = vsel %vm132_vm11, %v135_v8, %v138_v32 }
  0xd4   :  { %v140_v34 = vsel %vm129_vm13, nan, %v139_v33 }
  0xd5   :  { %142 = vst.msk [vmem:[#allocation2] sm:$0xff] %vm141_vm12, %v140_v34 }
  0xd6   :  { %191 = shalt.err (!%p188_p4)
}
  0xd7   :  { %s192_s20 = scalar_lea.hbm %s277_s3, 128 }
  0xd8   :  { %p193_p5 = scmp.ne.s32.totalorder %s277_s3, %s192_s20  ;;  %p196_p6 = scmp.lt.u32.totalorder %s192_s20, %s277_s3 }
  0xda   :  { %p198_p7 = pnand %p196_p6, %p193_p5 }
  0xdc   :  { %201 = shalt.err (!%p198_p7)
}
  0xdd   :  { %152 = dma.vmem_to_hbm [thread:$0]  %s150_s1, 128, %s277_s3, [#allocation3]  }
  0xde   :  { %202 = dma.done.wait [#allocation3], 128  }
  0xdf   :  { %203 = vsyncadd [#allocation3], 4294967168 }
  0xe0   :  { %156 = vsyncpa [#allocation3], 1 }

</bundles_post_ra>
